<compile_context>
chip_gen: v6e
topology: v6e:2x2x1
jax: 0.10.0
libtpu: 0.0.40
codegen_flags: <defaults>
</compile_context>

<pallas_src>
import functools

import jax
import jax.numpy as jnp
from jax import lax
from jax.experimental import pallas as pl
from jax.experimental.pallas import tpu as pltpu


def _round_up(x, m):
    return -(-x // m) * m


def _num_tensorcores():
    """Best-effort TensorCores-per-device (megacore gens v4 / v5p / v7x -> 2)."""
    try:
        kind = jax.devices()[0].device_kind.lower().replace(" ", "")
        if "v7" in kind or "7x" in kind:
            return 2
        if "v4" in kind:
            return 2
        if "v5p" in kind or ("v5" in kind and "lite" not in kind and "5e" not in kind):
            return 2
    except Exception:
        pass
    return 1


def _choose_block_batch(B, n_pad, v_dim, q_dim, hidden, cores,
                        *, stream_budget_bytes=40 << 20):
    """Batches per grid step: ~512 rows/step (1024 on megacore gens) of TB*Np,
    capped so the double-buffered bf16 v slab + f32 hv intermediate fit a
    v7x-safe VMEM budget; grid length nudged to a multiple of the TC count."""
    target_rows = 1024 if cores > 1 else 512
    tb_rows = max(1, target_rows // n_pad)

    weight_bytes = (v_dim + q_dim) * hidden * 2 + 3 * hidden * 4
    per_batch = (2 * n_pad * v_dim * 2      # v slab (bf16, double-buffered)
                 + 2 * q_dim * 2            # q block (bf16, double-buffered)
                 + n_pad * hidden * 4       # hv intermediate (f32)
                 + 2 * hidden * 4           # hq / w_eff (f32)
                 + 2 * n_pad * 4)           # out block (f32, double-buffered)
    tb_vmem = max(1, (stream_budget_bytes - 2 * weight_bytes) // per_batch)

    tb = int(max(1, min(B, tb_rows, tb_vmem)))

    # Megacore / v7x: prefer a grid length that is a multiple of the core count,
    # but only if that does not blow up the number of steps.
    if cores > 1 and B > 1:
        g = -(-B // tb)
        g_target = max(cores, _round_up(g, cores))
        tb_even = max(1, -(-B // g_target))
        if (-(-B // tb_even)) % cores == 0:
            tb = tb_even
    return tb


def _vmem_limit_bytes(tb, n_pad, v_dim, q_dim, hidden, single_buffer_weights):
    wmul = 1 if single_buffer_weights else 2
    weight_bytes = (v_dim + q_dim) * hidden * 2 + 3 * hidden * 4
    est = (2 * tb * n_pad * v_dim * 2        # v slab
           + 2 * tb * q_dim * 2              # q block
           + 2 * tb * n_pad * 4              # out block
           + wmul * weight_bytes
           + tb * n_pad * hidden * 4         # hv intermediate
           + 2 * tb * hidden * 4             # hq / w_eff
           + (2 << 20))                      # compiler scratch slack
    # >= 32 MiB (v5e/v6e defaults are 16/32 MiB); the TB budget keeps this well
    # under v7x's 64 MiB physical VMEM.
    return int(min(max(est * 5 // 4, 32 << 20), 96 << 20))


def _mult_attn_kernel(v_ref, q_ref, wv_ref, bv_ref, wq_ref, bq_ref,
                      wl_ref, bl_ref, out_ref, *, n_valid):
    # v_ref: [1, TB*Np, v_dim] bf16; q_ref: [1, TB, q_dim] bf16; out_ref: [1, TB, Np] f32
    # wv: [v_dim, H] bf16; wq: [q_dim, H] bf16; bv/bq/wl: [1, H] f32; bl: SMEM f32[1]
    tb = out_ref.shape[1]
    n_pad = out_ref.shape[2]

    v = v_ref[0]                                   # [TB*Np, v_dim] bf16
    q = q_ref[0]                                   # [TB, q_dim] bf16

    # Batched q projection once per block (amortized over TB batches); f32 accumulate.
    hq = jnp.dot(q, wq_ref[...], preferred_element_type=jnp.float32) + bq_ref[...]
    hq = jnp.maximum(hq, 0.0)                      # [TB, H] f32

    # Fold hq and the final Linear(hidden -> 1) weight into a per-batch reduce vector:
    #   logits[b, n] = sum_h hv[b, n, h] * (hq[b, h] * w_lin[h]) + b_lin
    w_eff = hq * wl_ref[...]                       # [TB, H] f32

    # Visual-feature projection for all TB*Np rows in one MXU matmul (bf16 in, f32 acc).
    hv = jnp.dot(v, wv_ref[...], preferred_element_type=jnp.float32) + bv_ref[...]
    hv = jnp.maximum(hv, 0.0)                      # [TB*Np, H] f32
    hv = hv.reshape(tb, n_pad, hv.shape[-1])       # [TB, Np, H] (Np multiple of 8)

    # Dropout is identity at inference; the explicit joint = hv*hq tensor is folded away.
    logits = jnp.sum(hv * w_eff[:, None, :], axis=-1) + bl_ref[0]   # [TB, Np] (lanes)

    # Padded object columns are NOT zero after +bv, ReLU -> mask them out of the softmax.
    if n_valid != n_pad:
        col = lax.broadcasted_iota(jnp.int32, (tb, n_pad), 1)
        logits = jnp.where(col < n_valid, logits, -jnp.inf)

    # Softmax over the num_objs axis (lane-axis reductions); exact normalization.
    m = jnp.max(logits, axis=-1, keepdims=True)    # [TB, 1]
    e = jnp.exp(logits - m)                        # [TB, Np]
    s = jnp.sum(e, axis=-1, keepdims=True)         # [TB, 1]
    out_ref[0] = e * (1.0 / s)


def multiply_attention(v, q, wv, bv, wq, bq, wl, bl, *, block_batch=None):
    """v: [B, N, v_dim] f32, q: [B, q_dim] f32.
    wv: [v_dim, H], bv: [1, H], wq: [q_dim, H], bq: [1, H], wl: [H, 1], bl: [1, 1]
    (effective dense weights; weight_norm is only a re-parameterization).
    Returns softmax attention weights [B, N, 1] (f32)."""
    B, N, v_dim = v.shape
    q_dim = q.shape[1]
    H = wv.shape[1]

    n_pad = _round_up(N, 8)                 # sublane-align the per-batch object count
    cores = _num_tensorcores()
    TB = _choose_block_batch(B, n_pad, v_dim, q_dim, H, cores) \
        if block_batch is None else int(block_batch)
    G = pl.cdiv(B, TB)
    B_pad = G * TB                          # zero-padded batches are computed & dropped

    # bf16 streamed operands (halves the dominant HBM traffic; f32 accumulation inside).
    v_bf = v.astype(jnp.bfloat16)
    q_bf = q.astype(jnp.bfloat16)
    if (n_pad != N) or (B_pad != B):
        v_bf = jnp.pad(v_bf, ((0, B_pad - B), (0, n_pad - N), (0, 0)))
    if B_pad != B:
        q_bf = jnp.pad(q_bf, ((0, B_pad - B), (0, 0)))

    v_blk = v_bf.reshape(G, TB * n_pad, v_dim)     # per-step slab of TB*Np rows
    q_blk = q_bf.reshape(G, TB, q_dim)
    wv_bf = wv.astype(jnp.bfloat16)
    wq_bf = wq.astype(jnp.bfloat16)
    bv_f = bv.reshape(1, H).astype(jnp.float32)
    bq_f = bq.reshape(1, H).astype(jnp.float32)
    wl_row = wl.reshape(1, H).astype(jnp.float32)  # [H, 1] -> [1, H] for the folded reduce
    bl_s = bl.reshape(1).astype(jnp.float32)       # scalar -> SMEM

    flops = 2 * B_pad * n_pad * v_dim * H + 2 * B_pad * q_dim * H + 4 * B_pad * n_pad * H
    transcendentals = B_pad * n_pad
    bytes_accessed = (2 * (v_blk.size + q_blk.size + wv_bf.size + wq_bf.size)
                      + 4 * (bv_f.size + bq_f.size + wl_row.size + bl_s.size
                             + B_pad * n_pad))
    cost = pl.CostEstimate(flops=flops, transcendentals=transcendentals,
                           bytes_accessed=bytes_accessed)

    kernel = functools.partial(_mult_attn_kernel, n_valid=N)

    def _run(single_buffer_weights):
        wkw = {}
        if single_buffer_weights:
            # Constant index_map -> double-buffering these only wastes VMEM (v7x: 64 MiB).
            wkw = dict(pipeline_mode=pl.Buffered(1))
        in_specs = [
            pl.BlockSpec((1, TB * n_pad, v_dim), lambda g: (g, 0, 0)),   # v slab
            pl.BlockSpec((1, TB, q_dim), lambda g: (g, 0, 0)),           # q block
            pl.BlockSpec((v_dim, H), lambda g: (0, 0), **wkw),           # Wv (bf16)
            pl.BlockSpec((1, H), lambda g: (0, 0), **wkw),               # bv
            pl.BlockSpec((q_dim, H), lambda g: (0, 0), **wkw),           # Wq (bf16)
            pl.BlockSpec((1, H), lambda g: (0, 0), **wkw),               # bq
            pl.BlockSpec((1, H), lambda g: (0, 0), **wkw),               # w_lin (row)
            pl.BlockSpec(memory_space=pltpu.MemorySpace.SMEM),           # b_lin scalar
        ]
        out = pl.pallas_call(
            kernel,
            out_shape=jax.ShapeDtypeStruct((G, TB, n_pad), jnp.float32),
            grid=(G,),
            in_specs=in_specs,
            out_specs=pl.BlockSpec((1, TB, n_pad), lambda g: (g, 0, 0)),  # lane-dense
            compiler_params=pltpu.CompilerParams(
                dimension_semantics=("parallel",),
                vmem_limit_bytes=_vmem_limit_bytes(
                    TB, n_pad, v_dim, q_dim, H, single_buffer_weights)),
            cost_estimate=cost,
        )(v_blk, q_blk, wv_bf, bv_f, wq_bf, bq_f, wl_row, bl_s)
        return jax.block_until_ready(out)

    try:
        out = _run(hasattr(pl, "Buffered"))
    except Exception:
        # Fallback path if this JAX build rejects pipeline_mode / Buffered(1).
        out = _run(False)

    out = out.reshape(B_pad, n_pad)[:B, :N]
    return out.reshape(B, N, 1)


def _reference(v, q, wv, bv, wq, bq, wl, bl):
    hv = jnp.maximum(v @ wv + bv, 0.0)                    # [B, N, H]
    hq = jnp.maximum(q @ wq + bq, 0.0)[:, None, :]        # [B, 1, H]
    joint = hv * hq
    logits = joint @ wl + bl[0, 0]                        # [B, N, 1]
    return jax.nn.softmax(logits, axis=1)


if __name__ == "__main__":
    # Small shapes consistent with the forward pass.
    B, N, V_DIM, Q_DIM, HID = 2, 8, 16, 32, 64

    key = jax.random.PRNGKey(0)
    ks = jax.random.split(key, 10)
    v = jax.random.normal(ks[0], (B, N, V_DIM), dtype=jnp.float32)
    q = jax.random.normal(ks[1], (B, Q_DIM), dtype=jnp.float32)

    # Deterministic synthetic parameters (effective weights after weight_norm).
    wv = 0.1 * jax.random.normal(ks[2], (V_DIM, HID), dtype=jnp.float32)
    bv = 0.05 * jax.random.normal(ks[3], (1, HID), dtype=jnp.float32)
    wq = 0.1 * jax.random.normal(ks[4], (Q_DIM, HID), dtype=jnp.float32)
    bq = 0.05 * jax.random.normal(ks[5], (1, HID), dtype=jnp.float32)
    wl = 0.1 * jax.random.normal(ks[6], (HID, 1), dtype=jnp.float32)
    bl = 0.05 * jax.random.normal(ks[7], (1, 1), dtype=jnp.float32)

    # Case 1: aligned N (no padding path).
    out = multiply_attention(v, q, wv, bv, wq, bq, wl, bl)
    out = jax.block_until_ready(out)
    ref = _reference(v, q, wv, bv, wq, bq, wl, bl)
    assert out.shape == (B, N, 1)
    # bf16 streamed operands (f32 accumulation) -> slightly relaxed tolerance.
    assert jnp.allclose(out, ref, atol=2e-2, rtol=2e-2), "mismatch vs reference (aligned N)"
    assert jnp.allclose(jnp.sum(out, axis=1), 1.0, atol=1e-4), "softmax rows must sum to 1"

    # Case 2: N not a multiple of 8 and awkward B -> exercises the pad+mask path.
    B2, N2 = 3, 5
    v2 = jax.random.normal(ks[8], (B2, N2, V_DIM), dtype=jnp.float32)
    q2 = jax.random.normal(ks[9], (B2, Q_DIM), dtype=jnp.float32)
    out2 = multiply_attention(v2, q2, wv, bv, wq, bq, wl, bl)
    out2 = jax.block_until_ready(out2)
    ref2 = _reference(v2, q2, wv, bv, wq, bq, wl, bl)
    assert out2.shape == (B2, N2, 1)
    assert jnp.allclose(out2, ref2, atol=2e-2, rtol=2e-2), "mismatch vs reference (padded N)"
    assert jnp.allclose(jnp.sum(out2, axis=1), 1.0, atol=1e-4), "softmax rows must sum to 1"

    print("KERNEL_OK")
</pallas_src>

<mosaic_0001>
module attributes {stable_mosaic.version = 11 : i64} {
  func.func @_mult_attn_kernel(%arg0: i32, %arg1: memref<1x16x16xbf16, #tpu.memory_space<vmem>>, %arg2: memref<1x2x32xbf16, #tpu.memory_space<vmem>>, %arg3: memref<16x64xbf16, #tpu.memory_space<vmem>>, %arg4: memref<1x64xf32, #tpu.memory_space<vmem>>, %arg5: memref<32x64xbf16, #tpu.memory_space<vmem>>, %arg6: memref<1x64xf32, #tpu.memory_space<vmem>>, %arg7: memref<1x64xf32, #tpu.memory_space<vmem>>, %arg8: memref<1xf32, #tpu.memory_space<smem>>, %arg9: memref<1x2x8xf32, #tpu.memory_space<vmem>>) attributes {dimension_semantics = [#tpu.dimension_semantics<parallel>], iteration_bounds = array<i64: 1>, scalar_prefetch = 0 : i64, scratch_operands = 0 : i64, tpu.core_type = #tpu.core_type<tc>, window_params = [{transform_indices = @transform_0, window_bounds = array<i64: 1, 16, 16>}, {transform_indices = @transform_1, window_bounds = array<i64: 1, 2, 32>}, {pipeline_mode = #tpu.pipeline_mode<synchronous>, transform_indices = @transform_2, window_bounds = array<i64: 16, 64>}, {pipeline_mode = #tpu.pipeline_mode<synchronous>, transform_indices = @transform_3, window_bounds = array<i64: 1, 64>}, {pipeline_mode = #tpu.pipeline_mode<synchronous>, transform_indices = @transform_4, window_bounds = array<i64: 32, 64>}, {pipeline_mode = #tpu.pipeline_mode<synchronous>, transform_indices = @transform_5, window_bounds = array<i64: 1, 64>}, {pipeline_mode = #tpu.pipeline_mode<synchronous>, transform_indices = @transform_6, window_bounds = array<i64: 1, 64>}, {transform_indices = @transform_7, window_bounds = array<i64: 1>}, {transform_indices = @transform_8, window_bounds = array<i64: 1, 2, 8>}]} {
    %c0 = arith.constant 0 : index
    %c0_0 = arith.constant 0 : index
    %c0_1 = arith.constant 0 : index
    %0 = vector.load %arg1[%c0, %c0_0, %c0_1] : memref<1x16x16xbf16, #tpu.memory_space<vmem>>, vector<1x16x16xbf16>
    %1 = vector.shape_cast %0 : vector<1x16x16xbf16> to vector<16x16xbf16>
    %c0_2 = arith.constant 0 : index
    %c0_3 = arith.constant 0 : index
    %c0_4 = arith.constant 0 : index
    %2 = vector.load %arg2[%c0_2, %c0_3, %c0_4] : memref<1x2x32xbf16, #tpu.memory_space<vmem>>, vector<1x2x32xbf16>
    %3 = vector.shape_cast %2 : vector<1x2x32xbf16> to vector<2x32xbf16>
    %c0_5 = arith.constant 0 : index
    %c0_6 = arith.constant 0 : index
    %4 = vector.load %arg5[%c0_5, %c0_6] : memref<32x64xbf16, #tpu.memory_space<vmem>>, vector<32x64xbf16>
    %cst = arith.constant dense<0.000000e+00> : vector<2x64xf32>
    %5 = tpu.matmul %3, %4, %cst {dimension_numbers = #tpu.dot_dimension_numbers<[1], [0], [0], [1], [0, 0, 1, 1], [], []>} : vector<2x32xbf16>, vector<32x64xbf16>, vector<2x64xf32> -> vector<2x64xf32>
    %c0_7 = arith.constant 0 : index
    %c0_8 = arith.constant 0 : index
    %6 = vector.load %arg6[%c0_7, %c0_8] : memref<1x64xf32, #tpu.memory_space<vmem>>, vector<1x64xf32>
    %7 = vector.broadcast %6 : vector<1x64xf32> to vector<2x64xf32>
    %8 = arith.addf %5, %7 : vector<2x64xf32>
    %cst_9 = arith.constant 0.000000e+00 : f32
    %9 = vector.broadcast %cst_9 : f32 to vector<2x64xf32>
    %10 = arith.maximumf %8, %9 : vector<2x64xf32>
    %c0_10 = arith.constant 0 : index
    %c0_11 = arith.constant 0 : index
    %11 = vector.load %arg7[%c0_10, %c0_11] : memref<1x64xf32, #tpu.memory_space<vmem>>, vector<1x64xf32>
    %12 = vector.broadcast %11 : vector<1x64xf32> to vector<2x64xf32>
    %13 = arith.mulf %10, %12 : vector<2x64xf32>
    %c0_12 = arith.constant 0 : index
    %c0_13 = arith.constant 0 : index
    %14 = vector.load %arg3[%c0_12, %c0_13] : memref<16x64xbf16, #tpu.memory_space<vmem>>, vector<16x64xbf16>
    %cst_14 = arith.constant dense<0.000000e+00> : vector<16x64xf32>
    %15 = tpu.matmul %1, %14, %cst_14 {dimension_numbers = #tpu.dot_dimension_numbers<[1], [0], [0], [1], [0, 0, 1, 1], [], []>} : vector<16x16xbf16>, vector<16x64xbf16>, vector<16x64xf32> -> vector<16x64xf32>
    %c0_15 = arith.constant 0 : index
    %c0_16 = arith.constant 0 : index
    %16 = vector.load %arg4[%c0_15, %c0_16] : memref<1x64xf32, #tpu.memory_space<vmem>>, vector<1x64xf32>
    %17 = vector.broadcast %16 : vector<1x64xf32> to vector<16x64xf32>
    %18 = arith.addf %15, %17 : vector<16x64xf32>
    %cst_17 = arith.constant 0.000000e+00 : f32
    %19 = vector.broadcast %cst_17 : f32 to vector<16x64xf32>
    %20 = arith.maximumf %18, %19 : vector<16x64xf32>
    %21 = vector.shape_cast %20 : vector<16x64xf32> to vector<2x8x64xf32>
    %22 = vector.shape_cast %13 : vector<2x64xf32> to vector<2x1x64xf32>
    %23 = vector.broadcast %22 : vector<2x1x64xf32> to vector<2x8x64xf32>
    %24 = arith.mulf %21, %23 : vector<2x8x64xf32>
    %cst_18 = arith.constant dense<0.000000e+00> : vector<2x8xf32>
    %25 = vector.multi_reduction <add>, %24, %cst_18 [2] : vector<2x8x64xf32> to vector<2x8xf32>
    %c0_19 = arith.constant 0 : index
    %26 = memref.load %arg8[%c0_19] : memref<1xf32, #tpu.memory_space<smem>>
    %27 = vector.broadcast %26 : f32 to vector<2x8xf32>
    %28 = arith.addf %25, %27 : vector<2x8xf32>
    %cst_20 = arith.constant dense<0xFF800000> : vector<2xf32>
    %29 = vector.multi_reduction <maximumf>, %28, %cst_20 [1] : vector<2x8xf32> to vector<2xf32>
    %30 = vector.shape_cast %29 : vector<2xf32> to vector<2x1xf32>
    %31 = vector.broadcast %30 : vector<2x1xf32> to vector<2x8xf32>
    %32 = arith.subf %28, %31 : vector<2x8xf32>
    %33 = math.exp %32 : vector<2x8xf32>
    %cst_21 = arith.constant dense<0.000000e+00> : vector<2xf32>
    %34 = vector.multi_reduction <add>, %33, %cst_21 [1] : vector<2x8xf32> to vector<2xf32>
    %35 = vector.shape_cast %34 : vector<2xf32> to vector<2x1xf32>
    %cst_22 = arith.constant 1.000000e+00 : f32
    %36 = vector.broadcast %cst_22 : f32 to vector<2x1xf32>
    %37 = arith.divf %36, %35 : vector<2x1xf32>
    %38 = vector.broadcast %37 : vector<2x1xf32> to vector<2x8xf32>
    %39 = arith.mulf %33, %38 : vector<2x8xf32>
    %c0_23 = arith.constant 0 : index
    %c0_24 = arith.constant 0 : index
    %c0_25 = arith.constant 0 : index
    %40 = vector.load %arg9[%c0_23, %c0_24, %c0_25] : memref<1x2x8xf32, #tpu.memory_space<vmem>>, vector<1x2x8xf32>
    %41 = vector.shape_cast %40 : vector<1x2x8xf32> to vector<2x8xf32>
    %42 = vector.shape_cast %39 : vector<2x8xf32> to vector<1x2x8xf32>
    tpu.vector_store %arg9[%c0_23, %c0_24, %c0_25], %42 {strides = array<i32>} : memref<1x2x8xf32, #tpu.memory_space<vmem>>, vector<1x2x8xf32>,
    return
  }
  func.func @transform_0(%arg0: i32) -> (i32, i32, i32) {
    %c0_i32 = arith.constant 0 : i32
    %c0_i32_0 = arith.constant 0 : i32
    %c0_i32_1 = arith.constant 0 : i32
    return %arg0, %c0_i32, %c0_i32_0 : i32, i32, i32
  }
  func.func @transform_1(%arg0: i32) -> (i32, i32, i32) {
    %c0_i32 = arith.constant 0 : i32
    %c0_i32_0 = arith.constant 0 : i32
    %c0_i32_1 = arith.constant 0 : i32
    return %arg0, %c0_i32, %c0_i32_0 : i32, i32, i32
  }
  func.func @transform_2(%arg0: i32) -> (i32, i32) {
    %c0_i32 = arith.constant 0 : i32
    %c0_i32_0 = arith.constant 0 : i32
    %c0_i32_1 = arith.constant 0 : i32
    return %c0_i32, %c0_i32_0 : i32, i32
  }
  func.func @transform_3(%arg0: i32) -> (i32, i32) {
    %c0_i32 = arith.constant 0 : i32
    %c0_i32_0 = arith.constant 0 : i32
    %c0_i32_1 = arith.constant 0 : i32
    return %c0_i32, %c0_i32_0 : i32, i32
  }
  func.func @transform_4(%arg0: i32) -> (i32, i32) {
    %c0_i32 = arith.constant 0 : i32
    %c0_i32_0 = arith.constant 0 : i32
    %c0_i32_1 = arith.constant 0 : i32
    return %c0_i32, %c0_i32_0 : i32, i32
  }
  func.func @transform_5(%arg0: i32) -> (i32, i32) {
    %c0_i32 = arith.constant 0 : i32
    %c0_i32_0 = arith.constant 0 : i32
    %c0_i32_1 = arith.constant 0 : i32
    return %c0_i32, %c0_i32_0 : i32, i32
  }
  func.func @transform_6(%arg0: i32) -> (i32, i32) {
    %c0_i32 = arith.constant 0 : i32
    %c0_i32_0 = arith.constant 0 : i32
    %c0_i32_1 = arith.constant 0 : i32
    return %c0_i32, %c0_i32_0 : i32, i32
  }
  func.func @transform_7(%arg0: i32) -> i32 {
    %c0_i32 = arith.constant 0 : i32
    %c0_i32_0 = arith.constant 0 : i32
    return %c0_i32 : i32
  }
  func.func @transform_8(%arg0: i32) -> (i32, i32, i32) {
    %c0_i32 = arith.constant 0 : i32
    %c0_i32_0 = arith.constant 0 : i32
    %c0_i32_1 = arith.constant 0 : i32
    return %arg0, %c0_i32, %c0_i32_0 : i32, i32, i32
  }
}

module attributes {stable_mosaic.version = 11 : i64} {
  func.func @_mult_attn_kernel(%arg0: i32, %arg1: memref<1x16x16xbf16, #tpu.memory_space<vmem>>, %arg2: memref<1x2x32xbf16, #tpu.memory_space<vmem>>, %arg3: memref<16x64xbf16, #tpu.memory_space<vmem>>, %arg4: memref<1x64xf32, #tpu.memory_space<vmem>>, %arg5: memref<32x64xbf16, #tpu.memory_space<vmem>>, %arg6: memref<1x64xf32, #tpu.memory_space<vmem>>, %arg7: memref<1x64xf32, #tpu.memory_space<vmem>>, %arg8: memref<1xf32, #tpu.memory_space<smem>>, %arg9: memref<1x2x8xf32, #tpu.memory_space<vmem>>) attributes {dimension_semantics = [#tpu.dimension_semantics<parallel>], iteration_bounds = array<i64: 1>, scalar_prefetch = 0 : i64, scratch_operands = 0 : i64, tpu.core_type = #tpu.core_type<tc>, window_params = [{transform_indices = @transform_0, window_bounds = array<i64: 1, 16, 16>}, {transform_indices = @transform_1, window_bounds = array<i64: 1, 2, 32>}, {pipeline_mode = #tpu.pipeline_mode<synchronous>, transform_indices = @transform_2, window_bounds = array<i64: 16, 64>}, {pipeline_mode = #tpu.pipeline_mode<synchronous>, transform_indices = @transform_3, window_bounds = array<i64: 1, 64>}, {pipeline_mode = #tpu.pipeline_mode<synchronous>, transform_indices = @transform_4, window_bounds = array<i64: 32, 64>}, {pipeline_mode = #tpu.pipeline_mode<synchronous>, transform_indices = @transform_5, window_bounds = array<i64: 1, 64>}, {pipeline_mode = #tpu.pipeline_mode<synchronous>, transform_indices = @transform_6, window_bounds = array<i64: 1, 64>}, {transform_indices = @transform_7, window_bounds = array<i64: 1>}, {transform_indices = @transform_8, window_bounds = array<i64: 1, 2, 8>}]} {
    %c0 = arith.constant 0 : index
    %c0_0 = arith.constant 0 : index
    %c0_1 = arith.constant 0 : index
    %0 = vector.load %arg1[%c0, %c0_0, %c0_1] : memref<1x16x16xbf16, #tpu.memory_space<vmem>>, vector<1x16x16xbf16>
    %1 = vector.shape_cast %0 : vector<1x16x16xbf16> to vector<16x16xbf16>
    %c0_2 = arith.constant 0 : index
    %c0_3 = arith.constant 0 : index
    %c0_4 = arith.constant 0 : index
    %2 = vector.load %arg2[%c0_2, %c0_3, %c0_4] : memref<1x2x32xbf16, #tpu.memory_space<vmem>>, vector<1x2x32xbf16>
    %3 = vector.shape_cast %2 : vector<1x2x32xbf16> to vector<2x32xbf16>
    %c0_5 = arith.constant 0 : index
    %c0_6 = arith.constant 0 : index
    %4 = vector.load %arg5[%c0_5, %c0_6] : memref<32x64xbf16, #tpu.memory_space<vmem>>, vector<32x64xbf16>
    %cst = arith.constant dense<0.000000e+00> : vector<2x64xf32>
    %5 = tpu.matmul %3, %4, %cst {dimension_numbers = #tpu.dot_dimension_numbers<[1], [0], [0], [1], [0, 0, 1, 1], [], []>} : vector<2x32xbf16>, vector<32x64xbf16>, vector<2x64xf32> -> vector<2x64xf32>
    %c0_7 = arith.constant 0 : index
    %c0_8 = arith.constant 0 : index
    %6 = vector.load %arg6[%c0_7, %c0_8] : memref<1x64xf32, #tpu.memory_space<vmem>>, vector<1x64xf32>
    %7 = vector.broadcast %6 : vector<1x64xf32> to vector<2x64xf32>
    %8 = arith.addf %5, %7 : vector<2x64xf32>
    %cst_9 = arith.constant 0.000000e+00 : f32
    %9 = vector.broadcast %cst_9 : f32 to vector<2x64xf32>
    %10 = arith.maximumf %8, %9 : vector<2x64xf32>
    %c0_10 = arith.constant 0 : index
    %c0_11 = arith.constant 0 : index
    %11 = vector.load %arg7[%c0_10, %c0_11] : memref<1x64xf32, #tpu.memory_space<vmem>>, vector<1x64xf32>
    %12 = vector.broadcast %11 : vector<1x64xf32> to vector<2x64xf32>
    %13 = arith.mulf %10, %12 : vector<2x64xf32>
    %c0_12 = arith.constant 0 : index
    %c0_13 = arith.constant 0 : index
    %14 = vector.load %arg3[%c0_12, %c0_13] : memref<16x64xbf16, #tpu.memory_space<vmem>>, vector<16x64xbf16>
    %cst_14 = arith.constant dense<0.000000e+00> : vector<16x64xf32>
    %15 = tpu.matmul %1, %14, %cst_14 {dimension_numbers = #tpu.dot_dimension_numbers<[1], [0], [0], [1], [0, 0, 1, 1], [], []>} : vector<16x16xbf16>, vector<16x64xbf16>, vector<16x64xf32> -> vector<16x64xf32>
    %c0_15 = arith.constant 0 : index
    %c0_16 = arith.constant 0 : index
    %16 = vector.load %arg4[%c0_15, %c0_16] : memref<1x64xf32, #tpu.memory_space<vmem>>, vector<1x64xf32>
    %17 = vector.broadcast %16 : vector<1x64xf32> to vector<16x64xf32>
    %18 = arith.addf %15, %17 : vector<16x64xf32>
    %cst_17 = arith.constant 0.000000e+00 : f32
    %19 = vector.broadcast %cst_17 : f32 to vector<16x64xf32>
    %20 = arith.maximumf %18, %19 : vector<16x64xf32>
    %21 = vector.shape_cast %20 : vector<16x64xf32> to vector<2x8x64xf32>
    %22 = vector.shape_cast %13 : vector<2x64xf32> to vector<2x1x64xf32>
    %23 = vector.broadcast %22 : vector<2x1x64xf32> to vector<2x8x64xf32>
    %24 = arith.mulf %21, %23 : vector<2x8x64xf32>
    %cst_18 = arith.constant dense<0.000000e+00> : vector<2x8xf32>
    %25 = vector.multi_reduction <add>, %24, %cst_18 [2] : vector<2x8x64xf32> to vector<2x8xf32>
    %c0_19 = arith.constant 0 : index
    %26 = memref.load %arg8[%c0_19] : memref<1xf32, #tpu.memory_space<smem>>
    %27 = vector.broadcast %26 : f32 to vector<2x8xf32>
    %28 = arith.addf %25, %27 : vector<2x8xf32>
    %cst_20 = arith.constant dense<0xFF800000> : vector<2xf32>
    %29 = vector.multi_reduction <maximumf>, %28, %cst_20 [1] : vector<2x8xf32> to vector<2xf32>
    %30 = vector.shape_cast %29 : vector<2xf32> to vector<2x1xf32>
    %31 = vector.broadcast %30 : vector<2x1xf32> to vector<2x8xf32>
    %32 = arith.subf %28, %31 : vector<2x8xf32>
    %33 = math.exp %32 : vector<2x8xf32>
    %cst_21 = arith.constant dense<0.000000e+00> : vector<2xf32>
    %34 = vector.multi_reduction <add>, %33, %cst_21 [1] : vector<2x8xf32> to vector<2xf32>
    %35 = vector.shape_cast %34 : vector<2xf32> to vector<2x1xf32>
    %cst_22 = arith.constant 1.000000e+00 : f32
    %36 = vector.broadcast %cst_22 : f32 to vector<2x1xf32>
    %37 = arith.divf %36, %35 : vector<2x1xf32>
    %38 = vector.broadcast %37 : vector<2x1xf32> to vector<2x8xf32>
    %39 = arith.mulf %33, %38 : vector<2x8xf32>
    %c0_23 = arith.constant 0 : index
    %c0_24 = arith.constant 0 : index
    %c0_25 = arith.constant 0 : index
    %40 = vector.load %arg9[%c0_23, %c0_24, %c0_25] : memref<1x2x8xf32, #tpu.memory_space<vmem>>, vector<1x2x8xf32>
    %41 = vector.shape_cast %40 : vector<1x2x8xf32> to vector<2x8xf32>
    %42 = vector.shape_cast %39 : vector<2x8xf32> to vector<1x2x8xf32>
    tpu.vector_store %arg9[%c0_23, %c0_24, %c0_25], %42 {strides = array<i32>} : memref<1x2x8xf32, #tpu.memory_space<vmem>>, vector<1x2x8xf32>,
    return
  }
  func.func @transform_0(%arg0: i32) -> (i32, i32, i32) {
    %c0_i32 = arith.constant 0 : i32
    %c0_i32_0 = arith.constant 0 : i32
    %c0_i32_1 = arith.constant 0 : i32
    return %arg0, %c0_i32, %c0_i32_0 : i32, i32, i32
  }
  func.func @transform_1(%arg0: i32) -> (i32, i32, i32) {
    %c0_i32 = arith.constant 0 : i32
    %c0_i32_0 = arith.constant 0 : i32
    %c0_i32_1 = arith.constant 0 : i32
    return %arg0, %c0_i32, %c0_i32_0 : i32, i32, i32
  }
  func.func @transform_2(%arg0: i32) -> (i32, i32) {
    %c0_i32 = arith.constant 0 : i32
    %c0_i32_0 = arith.constant 0 : i32
    %c0_i32_1 = arith.constant 0 : i32
    return %c0_i32, %c0_i32_0 : i32, i32
  }
  func.func @transform_3(%arg0: i32) -> (i32, i32) {
    %c0_i32 = arith.constant 0 : i32
    %c0_i32_0 = arith.constant 0 : i32
    %c0_i32_1 = arith.constant 0 : i32
    return %c0_i32, %c0_i32_0 : i32, i32
  }
  func.func @transform_4(%arg0: i32) -> (i32, i32) {
    %c0_i32 = arith.constant 0 : i32
    %c0_i32_0 = arith.constant 0 : i32
    %c0_i32_1 = arith.constant 0 : i32
    return %c0_i32, %c0_i32_0 : i32, i32
  }
  func.func @transform_5(%arg0: i32) -> (i32, i32) {
    %c0_i32 = arith.constant 0 : i32
    %c0_i32_0 = arith.constant 0 : i32
    %c0_i32_1 = arith.constant 0 : i32
    return %c0_i32, %c0_i32_0 : i32, i32
  }
  func.func @transform_6(%arg0: i32) -> (i32, i32) {
    %c0_i32 = arith.constant 0 : i32
    %c0_i32_0 = arith.constant 0 : i32
    %c0_i32_1 = arith.constant 0 : i32
    return %c0_i32, %c0_i32_0 : i32, i32
  }
  func.func @transform_7(%arg0: i32) -> i32 {
    %c0_i32 = arith.constant 0 : i32
    %c0_i32_0 = arith.constant 0 : i32
    return %c0_i32 : i32
  }
  func.func @transform_8(%arg0: i32) -> (i32, i32, i32) {
    %c0_i32 = arith.constant 0 : i32
    %c0_i32_0 = arith.constant 0 : i32
    %c0_i32_1 = arith.constant 0 : i32
    return %arg0, %c0_i32, %c0_i32_0 : i32, i32, i32
  }
}

</mosaic_0001>

<bundles_post_ra>
// kernel: tpu_custom_call.1
= control target key start
LH: loop header
LB: loop body
LE: loop exit
PB: predicated region body
PF: predicated region fallthrough
CT: control target
= control target key end

     0   :  { %14 = vsyncpa [#allocation4], 0  ;;  %s602_s0 = inlined_call_operand.hbm [shape: bf16[1,16,16], index: 0, kind: input, shape index: {}]   ;;  %s603_s1 = inlined_call_operand.vmem [shape: bf16[1,2,32], index: 1, kind: input, shape index: {}]   ;;  %s604_s2 = inlined_call_operand.hbm [shape: bf16[16,64], index: 2, kind: input, shape index: {}]   ;;  %s605_s3 = inlined_call_operand.vmem [shape: f32[1,64], index: 3, kind: input, shape index: {}]   ;;  %s606_s4 = inlined_call_operand.hbm [shape: bf16[32,64], index: 4, kind: input, shape index: {}]   ;;  %s607_s5 = inlined_call_operand.vmem [shape: f32[1,64], index: 5, kind: input, shape index: {}]   ;;  %s608_s6 = inlined_call_operand.vmem [shape: f32[1,64], index: 6, kind: input, shape index: {}]   ;;  %s609_s7 = inlined_call_operand.<no memory space> [shape: f32[1], index: 7, kind: input, shape index: {}]   ;;  %s610_s8 = inlined_call_operand.hbm [shape: f32[1,2,8], index: 8, kind: output, shape index: {}]  }
   0x1   :  { %15 = vsyncpa [#allocation7], 0 }
   0x2   :  { %16 = vsyncpa [#allocation5], 0  ;;  %s508_s27 = smov [#allocation6]   ;;  %s509_s29 = smov [#allocation3]  }
   0x3   :  { %s36_s28 = sshll.u32 %s508_s27, 4  ;;  %s22_s30 = sshll.u32 %s509_s29, 4  ;;  %s37_s28 = int_to_ptr.vmem [resolvable:$true] %s36_s28  ;;  %s23_s30 = int_to_ptr.vmem [resolvable:$true] %s22_s30 }
   0x4   :  { %s430_s9 = scalar_lea.vmem %s37_s28, 128  ;;  %p435_p1 = scmp.lt.s32.totalorder %s37_s28, %s37_s28 }
   0x5   :  { %p431_p0 = scmp.ne.s32.totalorder %s37_s28, %s430_s9  ;;  %p436_p2 = scmp.lt.s32.totalorder %s430_s9, %s430_s9 }
   0x7   :  { %p437_p3 = por %p436_p2, %p435_p1 }
   0x9   :  { %p438_p4 = pnand %p437_p3, %p431_p0 }
   0xb   :  { %441 = shalt.err (!%p438_p4)
}
   0xc   :  { %s510_s10 = smov 64   ;;  %s511_s11 = smov 4  }
   0xd   :  { %42 = dma.hbm_to_vmem [thread:$0]  %s604_s2, 128, %s37_s28, [#allocation7], %s510_s10, %s510_s10, %s511_s11  }
   0xe   :  { %s450_s14 = scalar_lea.vmem %s23_s30, 128  ;;  %p455_p6 = scmp.lt.s32.totalorder %s23_s30, %s23_s30 }
   0xf   :  { %p451_p5 = scmp.ne.s32.totalorder %s23_s30, %s450_s14  ;;  %p456_p7 = scmp.lt.s32.totalorder %s450_s14, %s450_s14 }
  0x11   :  { %p457_p8 = por %p456_p7, %p455_p6 }
  0x13   :  { %p458_p9 = pnand %p457_p8, %p451_p5 }
  0x15   :  { %461 = shalt.err (!%p458_p9)
}
  0x16   :  { %28 = dma.hbm_to_vmem [thread:$0]  %s602_s0, 128, %s23_s30, [#allocation4], %s510_s10, %s510_s10, %s511_s11  }
  0x17   :  { %s512_s17 = smov [#allocation8]  }
  0x18   :  { %s50_s18 = sshll.u32 %s512_s17, 4  ;;  %s51_s18 = int_to_ptr.vmem [resolvable:$true] %s50_s18 }
  0x19   :  { %s470_s19 = scalar_lea.vmem %s51_s18, 256  ;;  %p475_p11 = scmp.lt.s32.totalorder %s51_s18, %s51_s18 }
  0x1a   :  { %p471_p10 = scmp.ne.s32.totalorder %s51_s18, %s470_s19  ;;  %p476_p12 = scmp.lt.s32.totalorder %s470_s19, %s470_s19 }
  0x1c   :  { %p477_p13 = por %p476_p12, %p475_p11 }
  0x1e   :  { %p478_p0 = pnand %p477_p13, %p471_p10 }
  0x20   :  { %481 = shalt.err (!%p478_p0)
}
  0x21   :  { %56 = dma.hbm_to_vmem [thread:$0]  %s606_s4, 256, %s51_s18, [#allocation7], %s510_s10, %s510_s10, %s511_s11  }
  0x22   :  { %502 = dma.done.wait [#allocation4], 128  }
  0x23   :  { %503 = vsyncadd [#allocation4], 4294967168 }
  0x24   :  { %504 = dma.done.wait [#allocation7], 384  }
  0x25   :  { %505 = vsyncadd [#allocation7], 4294966912  ;;  %v513_v0 = vmov 0.0   ;;  %vm514_vm0 = vmmov 0   ;;  %v412_v1 = vld [vmem:[#allocation8 + $0x8] sm:$0xff]   ;;  %v413_v2 = vld [vmem:[#allocation8] sm:$0xff]   ;;  %v223_v8 = vlaneseq  ;;  %v262_v42 = vstv %s609_s7 }
  0x26   :  { %386 = vmatprep.subr.bf16.mxu0 %v513_v0  ;;  %394 = vmatprep.subr.bf16.mxu1 %v513_v0  ;;  %v414_v3 = vld [vmem:[#allocation6] sm:$0xff]   ;;  %v415_v4 = vld [vmem:[#allocation3] sm:$0xff]   ;;  %vm172_vm1 = vcmask 130048   ;;  %vm99_vm2 = vcmask 261120   ;;  %v515_v6 = vmov 1966171168  }
  0x27   :  { %390 = vmatprep.mubr.msk.bf16.mxu0 %vm514_vm0, %v513_v0  ;;  %396 = vmatprep.mubr.msk.bf16.mxu1 %vm514_vm0, %v513_v0  ;;  %v75_v5 = vld [vmem:[%s603_s1] sm:$0x1]  ;;  %v221_v7 = vunpack.c.l.s4 %v515_v6  ;;  %v578_v12 = vshrl.u32 %v223_v8, 7  ;;  %vm254_vm3 = vcmask 523264   ;;  %v268_v41 = vand.u32 127, %v223_v8 }
  0x28   :  { %387 = vmatpush3.bf16.msra.mxu0 %v412_v1  ;;  %395 = vmatpush3.bf16.msra.mxu1 %v414_v3  ;;  %v372_v9 = vld [vmem:[%s607_s5] ss:$0 sm:$0xff]  ;;  %vm277_vm4 = vcmask 1041409   ;;  %vm280_vm5 = vcmask 58368   ;;  %v516_v52 = vmov 0  }
  0x29   :  { %388 = vmatprep.subr.bf16.mxu0 %v513_v0  ;;  %v222_v11 = vunpack.c.0.s8 %v221_v7  ;;  %v376_v16 = vld [vmem:[%s608_s6] ss:$0 sm:$0xff]  ;;  %v244_v28 = vsub.s32 0, %v578_v12  ;;  %v271_v44 = vsub.s32 %v268_v41, %v578_v12  ;;  %411 = vset.pattern.permute.xlu0 %v516_v52  ;;  %v291_v53 = vsub.s32 1, %v578_v12  ;;  %s517_s6 = smov [#allocation9]  }
  0x2a   :  { %v377_v18 = vld [vmem:[%s605_s3] ss:$0 sm:$0xff]  ;;  %410 = vset.pattern.permute.xlu1 %v516_v52  ;;  %s362_s7 = sshll.u32 %s517_s6, 4  ;;  %s363_s7 = int_to_ptr.vmem [resolvable:$true] %s362_s7 }
  0x2b   :  { %397 = vmatmul.mubr.msk.bf16.vlgmr.msra.gmra.mxu1 %vm172_vm1, %v415_v4  ;;  %v225_v21 = vsub.s32 %v222_v11, %v578_v12  ;;  %s482_s26 = scalar_lea.vmem %s363_s7, 32  ;;  %p487_p2 = scmp.lt.s32.totalorder %s363_s7, %s363_s7 }
  0x2c   :  { %389 = vmatpush3.bf16.msra.mxu0 %v413_v2  ;;  %p483_p1 = scmp.ne.s32.totalorder %s363_s7, %s482_s26  ;;  %p488_p3 = scmp.lt.s32.totalorder %s482_s26, %s482_s26 }
  0x2e   :  { %p489_p4 = por %p488_p3, %p487_p2 }
  0x2f   :  { %391 = vmatmul.mubr.msk.bf16.vlgmr.msra.gmra.mxu0 %vm99_vm2, %v75_v5 }
  0x30   :  { %p490_p5 = pnand %p489_p4, %p483_p1 }
  0xeb   :  { %v210_v10 = vpop.f32.mrf.mxu1 }
  0xec   :  { %v211_v25 = vadd.f32 %v377_v18, %v210_v10 }
  0xed   :  { %v398_v14 = vpop.f32.mrf.mxu1 }
  0xee   :  { %v217_v30 = vmax.f32 %v211_v25, 0.0 }
  0xef   :  { %v137_v13 = vpop.f32.mrf.mxu0  ;;  %v213_v19 = vpop.f32.mrf.mxu1 }
  0xf0   :  { %v138_v15 = vadd.f32 %v372_v9, %v137_v13  ;;  %v214_v31 = vadd.f32 %v377_v18, %v213_v19 }
  0xf1   :  { %v392_v17 = vpop.f32.mrf.mxu0  ;;  %v399_v23 = vpop.f32.mrf.mxu1 }
  0xf2   :  { %v143_v20 = vmax.f32 %v138_v15, 0.0  ;;  %v218_v35 = vmax.f32 %v214_v31, 0.0 }
  0xf3   :  { %v140_v22 = vpop.f32.mrf.mxu0 }
  0xf4   :  { %v151_v24 = vmul.f32 %v376_v16, %v143_v20 }
  0xf5   :  { %v393_v26 = vpop.f32.mrf.mxu0 }
  0xf6   :  { %v226_v27 = vrot.slane %v151_v24, %v225_v21 }
  0xf8   :  { %v227_v29 = vcombine.high %v226_v27, %v226_v27  ;;  %v234_v32 = vrot.slane %v226_v27, %v225_v21 }
  0xfa   :  { %v245_v33 = vrot.slane %v234_v32, %v244_v28  ;;  %v241_v34 = vrot.slane %v227_v29, %v225_v21 }
  0xfc   :  { %v252_v36 = vmul.f32 %v245_v33, %v217_v30  ;;  %v249_v37 = vrot.slane %v241_v34, %v244_v28 }
  0xfe   :  { %v255_v38 = vsel %vm254_vm3, %v252_v36, 0.0  ;;  %v253_v39 = vmul.f32 %v249_v37, %v218_v35 }
  0xff   :  { %256 = vadd.xlane.f32.xlu0 %v255_v38 }
 0x100   :  { %v258_v40 = vsel %vm254_vm3, %v253_v39, 0.0 }
 0x103   :  { %259 = vadd.xlane.f32.xlu0 %v258_v40 }
 0x188   :  { %v257_v43 = vpop.xlane.xlu0 %256 }
 0x189   :  { %v263_v45 = vadd.f32 %v262_v42, %v257_v43 }
 0x18b   :  { %v272_v48 = vrot.slane %v263_v45, %v271_v44 }
 0x18c   :  { %v260_v46 = vpop.xlane.xlu0 %259 }
 0x18d   :  { %v264_v47 = vadd.f32 %v262_v42, %v260_v46 }
 0x18f   :  { %v276_v49 = vrot.slane %v264_v47, %v271_v44 }
 0x191   :  { %v278_v50 = vsel %vm277_vm4, %v276_v49, %v272_v48 }
 0x192   :  { %v281_v51 = vsel %vm280_vm5, %v278_v50, -inf }
 0x193   :  { %282 = vmax.xlane.f32.xlu1 %v281_v51 }
 0x21c   :  { %v283_v54 = vpop.xlane.xlu1 %282 }
 0x21d   :  { %v288_v55 = vrot.slane %v283_v54, %v244_v28  ;;  %v292_v56 = vrot.slane %v283_v54, %v291_v53 }
 0x21f   :  { %v295_v57 = vsub.f32 %v263_v45, %v288_v55  ;;  %v296_v58 = vsub.f32 %v264_v47, %v292_v56 }
 0x221   :  { %v297_v59 = vmul.f32 1.442695, %v295_v57  ;;  %v299_v60 = vmul.f32 1.442695, %v296_v58 }
 0x223   :  { %416 = vpow2.f32 %v297_v59 }
 0x224   :  { %418 = vpow2.f32 %v299_v60 }
 0x230   :  { %v417_v61 = vpop.eup %416 }
 0x231   :  { %v419_v62 = vpop.eup %418  ;;  %304 = vperm.xlu1 %410, %v417_v61  }
 0x232   :  { %307 = vperm.xlu0 %411, %v419_v62  }
 0x2ac   :  { %v305_v63 = vpop.permute.xlu1 %304 }
 0x2ad   :  { %v308_v0 = vpop.permute.xlu0 %307  ;;  %v312_v1 = vrot.slane %v305_v63, %v271_v44 }
 0x2ae   :  { %v316_v2 = vrot.slane %v308_v0, %v271_v44 }
 0x2b0   :  { %v317_v3 = vsel %vm277_vm4, %v316_v2, %v312_v1 }
 0x2b1   :  { %v319_v4 = vsel %vm280_vm5, %v317_v3, 0.0 }
 0x2b2   :  { %320 = vadd.xlane.f32.xlu1 %v319_v4 }
 0x33b   :  { %v321_v5 = vpop.xlane.xlu1 %320 }
 0x33c   :  { %420 = vrcp.f32 %v321_v5 }
 0x349   :  { %v421_v6 = vpop.eup %420 }
 0x34a   :  { %v328_v7 = vrot.slane %v421_v6, %v244_v28  ;;  %v332_v9 = vrot.slane %v421_v6, %v291_v53 }
 0x34c   :  { %v335_v8 = vmul.f32 %v417_v61, %v328_v7  ;;  %v336_v10 = vmul.f32 %v419_v62, %v332_v9 }
 0x34e   :  { %340 = vperm.xlu0 %411, %v335_v8  }
 0x352   :  { %343 = vperm.xlu0 %411, %v336_v10  }
 0x3c9   :  { %v341_v11 = vpop.permute.xlu0 %340 }
 0x3ca   :  { %v348_v13 = vrot.slane %v341_v11, %v271_v44 }
 0x3cd   :  { %v344_v12 = vpop.permute.xlu0 %343 }
 0x3ce   :  { %v352_v14 = vrot.slane %v344_v12, %v271_v44 }
 0x3d0   :  { %v353_v15 = vsel %vm277_vm4, %v352_v14, %v348_v13 }
 0x3d1   :  { %355 = vst.msk [vmem:[#allocation9] sm:$0x3] %vm280_vm5, %v353_v15 }
 0x3d2   :  { %493 = shalt.err (!%p490_p5)
}
 0x3d3   :  { %365 = dma.vmem_to_hbm [thread:$0]  %s363_s7, 32, %s610_s8, [#allocation5]  }
 0x3d4   :  { %506 = dma.done.wait [#allocation5], 32  }
 0x3d5   :  { %507 = vsyncadd [#allocation5], 4294967264 }
 0x3d6   :  { %369 = vsyncpa [#allocation4], 1 }
 0x3d7   :  { %370 = vsyncpa [#allocation7], 1 }
 0x3d8   :  { %371 = vsyncpa [#allocation5], 1 }

// kernel: tpu_custom_call.1
= control target key start
LH: loop header
LB: loop body
LE: loop exit
PB: predicated region body
PF: predicated region fallthrough
CT: control target
= control target key end

     0   :  { %14 = vsyncpa [#allocation4], 0  ;;  %s602_s0 = inlined_call_operand.hbm [shape: bf16[1,16,16], index: 0, kind: input, shape index: {}]   ;;  %s603_s1 = inlined_call_operand.vmem [shape: bf16[1,2,32], index: 1, kind: input, shape index: {}]   ;;  %s604_s2 = inlined_call_operand.hbm [shape: bf16[16,64], index: 2, kind: input, shape index: {}]   ;;  %s605_s3 = inlined_call_operand.vmem [shape: f32[1,64], index: 3, kind: input, shape index: {}]   ;;  %s606_s4 = inlined_call_operand.hbm [shape: bf16[32,64], index: 4, kind: input, shape index: {}]   ;;  %s607_s5 = inlined_call_operand.vmem [shape: f32[1,64], index: 5, kind: input, shape index: {}]   ;;  %s608_s6 = inlined_call_operand.vmem [shape: f32[1,64], index: 6, kind: input, shape index: {}]   ;;  %s609_s7 = inlined_call_operand.<no memory space> [shape: f32[1], index: 7, kind: input, shape index: {}]   ;;  %s610_s8 = inlined_call_operand.hbm [shape: f32[1,2,8], index: 8, kind: output, shape index: {}]  }
   0x1   :  { %15 = vsyncpa [#allocation7], 0 }
   0x2   :  { %16 = vsyncpa [#allocation5], 0  ;;  %s508_s27 = smov [#allocation6]   ;;  %s509_s29 = smov [#allocation3]  }
   0x3   :  { %s36_s28 = sshll.u32 %s508_s27, 4  ;;  %s22_s30 = sshll.u32 %s509_s29, 4  ;;  %s37_s28 = int_to_ptr.vmem [resolvable:$true] %s36_s28  ;;  %s23_s30 = int_to_ptr.vmem [resolvable:$true] %s22_s30 }
   0x4   :  { %s430_s9 = scalar_lea.vmem %s37_s28, 128  ;;  %p435_p1 = scmp.lt.s32.totalorder %s37_s28, %s37_s28 }
   0x5   :  { %p431_p0 = scmp.ne.s32.totalorder %s37_s28, %s430_s9  ;;  %p436_p2 = scmp.lt.s32.totalorder %s430_s9, %s430_s9 }
   0x7   :  { %p437_p3 = por %p436_p2, %p435_p1 }
   0x9   :  { %p438_p4 = pnand %p437_p3, %p431_p0 }
   0xb   :  { %441 = shalt.err (!%p438_p4)
}
   0xc   :  { %s510_s10 = smov 64   ;;  %s511_s11 = smov 4  }
   0xd   :  { %42 = dma.hbm_to_vmem [thread:$0]  %s604_s2, 128, %s37_s28, [#allocation7], %s510_s10, %s510_s10, %s511_s11  }
   0xe   :  { %s450_s14 = scalar_lea.vmem %s23_s30, 128  ;;  %p455_p6 = scmp.lt.s32.totalorder %s23_s30, %s23_s30 }
   0xf   :  { %p451_p5 = scmp.ne.s32.totalorder %s23_s30, %s450_s14  ;;  %p456_p7 = scmp.lt.s32.totalorder %s450_s14, %s450_s14 }
  0x11   :  { %p457_p8 = por %p456_p7, %p455_p6 }
  0x13   :  { %p458_p9 = pnand %p457_p8, %p451_p5 }
  0x15   :  { %461 = shalt.err (!%p458_p9)
}
  0x16   :  { %28 = dma.hbm_to_vmem [thread:$0]  %s602_s0, 128, %s23_s30, [#allocation4], %s510_s10, %s510_s10, %s511_s11  }
  0x17   :  { %s512_s17 = smov [#allocation8]  }
  0x18   :  { %s50_s18 = sshll.u32 %s512_s17, 4  ;;  %s51_s18 = int_to_ptr.vmem [resolvable:$true] %s50_s18 }
  0x19   :  { %s470_s19 = scalar_lea.vmem %s51_s18, 256  ;;  %p475_p11 = scmp.lt.s32.totalorder %s51_s18, %s51_s18 }
  0x1a   :  { %p471_p10 = scmp.ne.s32.totalorder %s51_s18, %s470_s19  ;;  %p476_p12 = scmp.lt.s32.totalorder %s470_s19, %s470_s19 }
  0x1c   :  { %p477_p13 = por %p476_p12, %p475_p11 }
  0x1e   :  { %p478_p0 = pnand %p477_p13, %p471_p10 }
  0x20   :  { %481 = shalt.err (!%p478_p0)
}
  0x21   :  { %56 = dma.hbm_to_vmem [thread:$0]  %s606_s4, 256, %s51_s18, [#allocation7], %s510_s10, %s510_s10, %s511_s11  }
  0x22   :  { %502 = dma.done.wait [#allocation4], 128  }
  0x23   :  { %503 = vsyncadd [#allocation4], 4294967168 }
  0x24   :  { %504 = dma.done.wait [#allocation7], 384  }
  0x25   :  { %505 = vsyncadd [#allocation7], 4294966912  ;;  %v513_v0 = vmov 0.0   ;;  %vm514_vm0 = vmmov 0   ;;  %v412_v1 = vld [vmem:[#allocation8 + $0x8] sm:$0xff]   ;;  %v413_v2 = vld [vmem:[#allocation8] sm:$0xff]   ;;  %v223_v8 = vlaneseq  ;;  %v262_v42 = vstv %s609_s7 }
  0x26   :  { %386 = vmatprep.subr.bf16.mxu0 %v513_v0  ;;  %394 = vmatprep.subr.bf16.mxu1 %v513_v0  ;;  %v414_v3 = vld [vmem:[#allocation6] sm:$0xff]   ;;  %v415_v4 = vld [vmem:[#allocation3] sm:$0xff]   ;;  %vm172_vm1 = vcmask 130048   ;;  %vm99_vm2 = vcmask 261120   ;;  %v515_v6 = vmov 1966171168  }
  0x27   :  { %390 = vmatprep.mubr.msk.bf16.mxu0 %vm514_vm0, %v513_v0  ;;  %396 = vmatprep.mubr.msk.bf16.mxu1 %vm514_vm0, %v513_v0  ;;  %v75_v5 = vld [vmem:[%s603_s1] sm:$0x1]  ;;  %v221_v7 = vunpack.c.l.s4 %v515_v6  ;;  %v578_v12 = vshrl.u32 %v223_v8, 7  ;;  %vm254_vm3 = vcmask 523264   ;;  %v268_v41 = vand.u32 127, %v223_v8 }
  0x28   :  { %387 = vmatpush3.bf16.msra.mxu0 %v412_v1  ;;  %395 = vmatpush3.bf16.msra.mxu1 %v414_v3  ;;  %v372_v9 = vld [vmem:[%s607_s5] ss:$0 sm:$0xff]  ;;  %vm277_vm4 = vcmask 1041409   ;;  %vm280_vm5 = vcmask 58368   ;;  %v516_v52 = vmov 0  }
  0x29   :  { %388 = vmatprep.subr.bf16.mxu0 %v513_v0  ;;  %v222_v11 = vunpack.c.0.s8 %v221_v7  ;;  %v376_v16 = vld [vmem:[%s608_s6] ss:$0 sm:$0xff]  ;;  %v244_v28 = vsub.s32 0, %v578_v12  ;;  %v271_v44 = vsub.s32 %v268_v41, %v578_v12  ;;  %411 = vset.pattern.permute.xlu0 %v516_v52  ;;  %v291_v53 = vsub.s32 1, %v578_v12  ;;  %s517_s6 = smov [#allocation9]  }
  0x2a   :  { %v377_v18 = vld [vmem:[%s605_s3] ss:$0 sm:$0xff]  ;;  %410 = vset.pattern.permute.xlu1 %v516_v52  ;;  %s362_s7 = sshll.u32 %s517_s6, 4  ;;  %s363_s7 = int_to_ptr.vmem [resolvable:$true] %s362_s7 }
  0x2b   :  { %397 = vmatmul.mubr.msk.bf16.vlgmr.msra.gmra.mxu1 %vm172_vm1, %v415_v4  ;;  %v225_v21 = vsub.s32 %v222_v11, %v578_v12  ;;  %s482_s26 = scalar_lea.vmem %s363_s7, 32  ;;  %p487_p2 = scmp.lt.s32.totalorder %s363_s7, %s363_s7 }
  0x2c   :  { %389 = vmatpush3.bf16.msra.mxu0 %v413_v2  ;;  %p483_p1 = scmp.ne.s32.totalorder %s363_s7, %s482_s26  ;;  %p488_p3 = scmp.lt.s32.totalorder %s482_s26, %s482_s26 }
  0x2e   :  { %p489_p4 = por %p488_p3, %p487_p2 }
  0x2f   :  { %391 = vmatmul.mubr.msk.bf16.vlgmr.msra.gmra.mxu0 %vm99_vm2, %v75_v5 }
  0x30   :  { %p490_p5 = pnand %p489_p4, %p483_p1 }
  0xeb   :  { %v210_v10 = vpop.f32.mrf.mxu1 }
  0xec   :  { %v211_v25 = vadd.f32 %v377_v18, %v210_v10 }
  0xed   :  { %v398_v14 = vpop.f32.mrf.mxu1 }
  0xee   :  { %v217_v30 = vmax.f32 %v211_v25, 0.0 }
  0xef   :  { %v137_v13 = vpop.f32.mrf.mxu0  ;;  %v213_v19 = vpop.f32.mrf.mxu1 }
  0xf0   :  { %v138_v15 = vadd.f32 %v372_v9, %v137_v13  ;;  %v214_v31 = vadd.f32 %v377_v18, %v213_v19 }
  0xf1   :  { %v392_v17 = vpop.f32.mrf.mxu0  ;;  %v399_v23 = vpop.f32.mrf.mxu1 }
  0xf2   :  { %v143_v20 = vmax.f32 %v138_v15, 0.0  ;;  %v218_v35 = vmax.f32 %v214_v31, 0.0 }
  0xf3   :  { %v140_v22 = vpop.f32.mrf.mxu0 }
  0xf4   :  { %v151_v24 = vmul.f32 %v376_v16, %v143_v20 }
  0xf5   :  { %v393_v26 = vpop.f32.mrf.mxu0 }
  0xf6   :  { %v226_v27 = vrot.slane %v151_v24, %v225_v21 }
  0xf8   :  { %v227_v29 = vcombine.high %v226_v27, %v226_v27  ;;  %v234_v32 = vrot.slane %v226_v27, %v225_v21 }
  0xfa   :  { %v245_v33 = vrot.slane %v234_v32, %v244_v28  ;;  %v241_v34 = vrot.slane %v227_v29, %v225_v21 }
  0xfc   :  { %v252_v36 = vmul.f32 %v245_v33, %v217_v30  ;;  %v249_v37 = vrot.slane %v241_v34, %v244_v28 }
  0xfe   :  { %v255_v38 = vsel %vm254_vm3, %v252_v36, 0.0  ;;  %v253_v39 = vmul.f32 %v249_v37, %v218_v35 }
  0xff   :  { %256 = vadd.xlane.f32.xlu0 %v255_v38 }
 0x100   :  { %v258_v40 = vsel %vm254_vm3, %v253_v39, 0.0 }
 0x103   :  { %259 = vadd.xlane.f32.xlu0 %v258_v40 }
 0x188   :  { %v257_v43 = vpop.xlane.xlu0 %256 }
 0x189   :  { %v263_v45 = vadd.f32 %v262_v42, %v257_v43 }
 0x18b   :  { %v272_v48 = vrot.slane %v263_v45, %v271_v44 }
 0x18c   :  { %v260_v46 = vpop.xlane.xlu0 %259 }
 0x18d   :  { %v264_v47 = vadd.f32 %v262_v42, %v260_v46 }
 0x18f   :  { %v276_v49 = vrot.slane %v264_v47, %v271_v44 }
 0x191   :  { %v278_v50 = vsel %vm277_vm4, %v276_v49, %v272_v48 }
 0x192   :  { %v281_v51 = vsel %vm280_vm5, %v278_v50, -inf }
 0x193   :  { %282 = vmax.xlane.f32.xlu1 %v281_v51 }
 0x21c   :  { %v283_v54 = vpop.xlane.xlu1 %282 }
 0x21d   :  { %v288_v55 = vrot.slane %v283_v54, %v244_v28  ;;  %v292_v56 = vrot.slane %v283_v54, %v291_v53 }
 0x21f   :  { %v295_v57 = vsub.f32 %v263_v45, %v288_v55  ;;  %v296_v58 = vsub.f32 %v264_v47, %v292_v56 }
 0x221   :  { %v297_v59 = vmul.f32 1.442695, %v295_v57  ;;  %v299_v60 = vmul.f32 1.442695, %v296_v58 }
 0x223   :  { %416 = vpow2.f32 %v297_v59 }
 0x224   :  { %418 = vpow2.f32 %v299_v60 }
 0x230   :  { %v417_v61 = vpop.eup %416 }
 0x231   :  { %v419_v62 = vpop.eup %418  ;;  %304 = vperm.xlu1 %410, %v417_v61  }
 0x232   :  { %307 = vperm.xlu0 %411, %v419_v62  }
 0x2ac   :  { %v305_v63 = vpop.permute.xlu1 %304 }
 0x2ad   :  { %v308_v0 = vpop.permute.xlu0 %307  ;;  %v312_v1 = vrot.slane %v305_v63, %v271_v44 }
 0x2ae   :  { %v316_v2 = vrot.slane %v308_v0, %v271_v44 }
 0x2b0   :  { %v317_v3 = vsel %vm277_vm4, %v316_v2, %v312_v1 }
 0x2b1   :  { %v319_v4 = vsel %vm280_vm5, %v317_v3, 0.0 }
 0x2b2   :  { %320 = vadd.xlane.f32.xlu1 %v319_v4 }
 0x33b   :  { %v321_v5 = vpop.xlane.xlu1 %320 }
 0x33c   :  { %420 = vrcp.f32 %v321_v5 }
 0x349   :  { %v421_v6 = vpop.eup %420 }
 0x34a   :  { %v328_v7 = vrot.slane %v421_v6, %v244_v28  ;;  %v332_v9 = vrot.slane %v421_v6, %v291_v53 }
 0x34c   :  { %v335_v8 = vmul.f32 %v417_v61, %v328_v7  ;;  %v336_v10 = vmul.f32 %v419_v62, %v332_v9 }
 0x34e   :  { %340 = vperm.xlu0 %411, %v335_v8  }
 0x352   :  { %343 = vperm.xlu0 %411, %v336_v10  }
 0x3c9   :  { %v341_v11 = vpop.permute.xlu0 %340 }
 0x3ca   :  { %v348_v13 = vrot.slane %v341_v11, %v271_v44 }
 0x3cd   :  { %v344_v12 = vpop.permute.xlu0 %343 }
 0x3ce   :  { %v352_v14 = vrot.slane %v344_v12, %v271_v44 }
 0x3d0   :  { %v353_v15 = vsel %vm277_vm4, %v352_v14, %v348_v13 }
 0x3d1   :  { %355 = vst.msk [vmem:[#allocation9] sm:$0x3] %vm280_vm5, %v353_v15 }
 0x3d2   :  { %493 = shalt.err (!%p490_p5)
}
 0x3d3   :  { %365 = dma.vmem_to_hbm [thread:$0]  %s363_s7, 32, %s610_s8, [#allocation5]  }
 0x3d4   :  { %506 = dma.done.wait [#allocation5], 32  }
 0x3d5   :  { %507 = vsyncadd [#allocation5], 4294967264 }
 0x3d6   :  { %369 = vsyncpa [#allocation4], 1 }
 0x3d7   :  { %370 = vsyncpa [#allocation7], 1 }
 0x3d8   :  { %371 = vsyncpa [#allocation5], 1 }

</bundles_post_ra>
